<compile_context>
chip_gen: v7x
topology: tpu7x:2x2x1
jax: 0.10.0
libtpu: 0.0.40
codegen_flags: <defaults>
</compile_context>

<pallas_src>
import functools
import math

import jax
import jax.numpy as jnp
from jax import lax
from jax.experimental import pallas as pl
from jax.experimental.pallas import tpu as pltpu

# donkey constants (synthetic, matching the original sim conventions)
ANGLES_WINDOW = 5
CONTROL_SIZE = 2
INPUTS_SIZE = 2 + ANGLES_WINDOW      # 7
IN_PAD = 8                           # layer-1 rows in the weight slab (sublane aligned)
OUT_PAD = 8                          # combined output rows: a in rows 0:4, v in row 4


def _policy_kernel(x_ref, w_ref, b_ref, out_ref, *, split_layer2):
    """Fused two-tower MLP, lane-dense transposed output.

    x_ref   : (TB, INPUTS_SIZE)  raw inputs (no host-side padding)
    w_ref   : (IN_PAD + 4H, 2H)  rows [0, IN_PAD)            = [W1a | W1v] (row 7 zero)
                                 rows [IN_PAD, IN_PAD+2H)    = blockdiag(W2a, W2v)
                                 rows [IN_PAD+2H, IN_PAD+4H) = W3 (cols 0:4 = W3a,
                                                                   col  4   = W3v)
    b_ref   : (8, 2H)            row0 = b1, row1 = b2, row2 = b3 (zero padded)
    out_ref : (OUT_PAD, TB)      rows 0:4 = a (tanh), row 4 = v (linear)
    """
    h2 = w_ref.shape[1]          # 2 * hidden_size
    H = h2 // 2
    n3 = min(h2, 128)            # only the first OUT_PAD layer-3 cols are nonzero
    cdt = w_ref.dtype            # MXU operand dtype (f32 or bf16)

    x = x_ref[...].astype(cdt)
    b = b_ref[...]               # f32 biases

    # layer 1 (both towers): (TB, 7) @ (7, 2H)
    w1 = w_ref[0:INPUTS_SIZE, :]
    y = jnp.tanh(jnp.dot(x, w1, preferred_element_type=jnp.float32) + b[0:1, :])

    # layer 2: fused block-diagonal dot, or two per-tower dots (v5e / large H)
    if split_layer2:
        w2a = w_ref[IN_PAD:IN_PAD + H, 0:H]
        w2v = w_ref[IN_PAD + H:IN_PAD + h2, H:h2]
        ya = jnp.tanh(jnp.dot(y[:, 0:H].astype(cdt), w2a,
                              preferred_element_type=jnp.float32) + b[1:2, 0:H])
        yv = jnp.tanh(jnp.dot(y[:, H:h2].astype(cdt), w2v,
                              preferred_element_type=jnp.float32) + b[1:2, H:h2])
        y = jnp.concatenate([ya, yv], axis=1)
    else:
        w2 = w_ref[IN_PAD:IN_PAD + h2, :]
        y = jnp.tanh(jnp.dot(y.astype(cdt), w2,
                             preferred_element_type=jnp.float32) + b[1:2, :])

    # layer 3: only the first n3 columns matter (cols 0:4 action, col 4 value)
    r3 = IN_PAD + h2
    w3 = w_ref[r3:r3 + h2, 0:n3]
    y = jnp.dot(y.astype(cdt), w3, preferred_element_type=jnp.float32) + b[2:3, 0:n3]
    y = y[:, 0:OUT_PAD]

    # action head tanh, value head (col 4) linear, padding cols stay zero
    col = lax.broadcasted_iota(jnp.int32, y.shape, 1)
    y = jnp.where(col < 2 * CONTROL_SIZE, jnp.tanh(y), y)

    # lane-dense store: (OUT_PAD, TB) instead of a lane-sparse (TB, 8) tile.
    # The (TB, 8) -> (8, TB) transpose goes to the (idle) XLU slot.
    out_ref[...] = y.T.astype(out_ref.dtype)


def _select_tile(B, h2, block_b, itemsize):
    """Pick the batch tile: whole batch if it fits, else a 128-multiple tile
    capped by a VMEM budget that is safe on v7x (64 MiB physical)."""
    # rough per-row activation footprint (f32 hidden intermediates + I/O tiles,
    # double-buffered I/O) plus the double-buffered resident weight slab
    per_row = 4 * (2 * h2 + 2 * OUT_PAD) + 2 * itemsize * INPUTS_SIZE
    w_resident = 2 * (IN_PAD + 2 * h2) * h2 * itemsize
    budget = max(4 << 20, (24 << 20) - w_resident)
    max_tb = max(128, (budget // per_row) // 128 * 128)
    block_b = max(128, (min(block_b, max_tb) // 128) * 128)
    if B <= block_b:
        return B, 1            # single grid step, full-dim blocks (any B is legal)
    return block_b, pl.cdiv(B, block_b)


def policy_forward(inputs, packed, *, block_b=2048, split_layer2=None,
                   use_bf16=False, core_parallel=False):
    """Pallas forward pass of the non-GRU Policy.

    inputs : (B, INPUTS_SIZE) f32
    packed : dict with 'w' (IN_PAD + 4H, 2H) and 'b' (8, 2H) slabs.
    Returns (v, a) with shapes (B, 1) and (B, 2*CONTROL_SIZE).
    """
    B = inputs.shape[0]
    w, b = packed['w'], packed['b']
    h2 = w.shape[1]
    if split_layer2 is None:
        split_layer2 = h2 > 256          # fused fits the 256-wide MXU on v6e/v7x

    x = inputs.astype(jnp.float32)
    if use_bf16:                         # bf16 MXU operands, f32 accumulation
        x = x.astype(jnp.bfloat16)
        w = w.astype(jnp.bfloat16)
    itemsize = 2 if use_bf16 else 4

    tb, grid = _select_tile(B, h2, block_b, itemsize)

    n3 = min(h2, 128)
    cost = pl.CostEstimate(
        flops=2 * B * (INPUTS_SIZE * h2 + h2 * h2 + h2 * n3),
        transcendentals=B * (2 * h2 + OUT_PAD),
        bytes_accessed=itemsize * (B * INPUTS_SIZE + w.size)
        + 4 * (b.size + OUT_PAD * B),
    )

    if core_parallel:
        dim_sem = (pltpu.CORE_PARALLEL,)   # v7x: split batch across the 2 TCs
    else:
        dim_sem = ("parallel",)

    out = pl.pallas_call(
        functools.partial(_policy_kernel, split_layer2=split_layer2),
        out_shape=jax.ShapeDtypeStruct((OUT_PAD, B), jnp.float32),
        grid_spec=pltpu.PrefetchScalarGridSpec(
            num_scalar_prefetch=0,
            grid=(grid,),
            in_specs=[
                pl.BlockSpec((tb, INPUTS_SIZE), lambda i: (i, 0)),  # batch-tiled x
                pl.BlockSpec(w.shape, lambda i: (0, 0)),            # resident weights
                pl.BlockSpec(b.shape, lambda i: (0, 0)),            # resident biases
            ],
            out_specs=pl.BlockSpec((OUT_PAD, tb), lambda i: (0, i)),  # lane-dense out
        ),
        compiler_params=pltpu.CompilerParams(
            dimension_semantics=dim_sem,
            vmem_limit_bytes=32 * 1024 * 1024),
        cost_estimate=cost,
    )(x, w, b)

    # Downstream consumers wanting max perf can use the (OUT_PAD, B) slab
    # directly; these small 5xB transposes restore the module's orientation.
    a = out[0:2 * CONTROL_SIZE, :].T
    v = out[2 * CONTROL_SIZE:2 * CONTROL_SIZE + 1, :].T
    return v, a


def _xavier_normal(key, fan_in, fan_out, gain):
    std = gain * math.sqrt(2.0 / (fan_in + fan_out))
    # stored (in, out) so the kernel does x @ W
    return std * jax.random.normal(key, (fan_in, fan_out), dtype=jnp.float32)


def init_params(key, hidden_size):
    gain_tanh = 5.0 / 3.0   # nn.init.calculate_gain('tanh')
    gain_lin = 1.0          # nn.init.calculate_gain('linear')
    keys = jax.random.split(key, 6)
    return {
        'w1a': _xavier_normal(keys[0], INPUTS_SIZE, hidden_size, gain_tanh),
        'b1a': jnp.zeros((1, hidden_size), jnp.float32),
        'w2a': _xavier_normal(keys[1], hidden_size, hidden_size, gain_tanh),
        'b2a': jnp.zeros((1, hidden_size), jnp.float32),
        'w3a': _xavier_normal(keys[2], hidden_size, 2 * CONTROL_SIZE, gain_tanh),
        'b3a': jnp.zeros((1, 2 * CONTROL_SIZE), jnp.float32),
        'w1v': _xavier_normal(keys[3], INPUTS_SIZE, hidden_size, gain_tanh),
        'b1v': jnp.zeros((1, hidden_size), jnp.float32),
        'w2v': _xavier_normal(keys[4], hidden_size, hidden_size, gain_tanh),
        'b2v': jnp.zeros((1, hidden_size), jnp.float32),
        'w3v': _xavier_normal(keys[5], hidden_size, 1, gain_lin),
        'b3v': jnp.zeros((1, 1), jnp.float32),
    }


def pack_params(params, hidden_size):
    """Pack the 12 per-layer tensors into one weight slab + one bias slab."""
    H = hidden_size
    h2 = 2 * H

    w = jnp.zeros((IN_PAD + 2 * h2, h2), jnp.float32)
    # layer 1: [W1a | W1v]  (row 7 stays zero)
    w = w.at[0:INPUTS_SIZE, 0:H].set(params['w1a'])
    w = w.at[0:INPUTS_SIZE, H:h2].set(params['w1v'])
    # layer 2: block-diag(W2a, W2v)
    w = w.at[IN_PAD:IN_PAD + H, 0:H].set(params['w2a'])
    w = w.at[IN_PAD + H:IN_PAD + h2, H:h2].set(params['w2v'])
    # layer 3: cols 0:4 <- W3a, col 4 <- W3v
    r3 = IN_PAD + h2
    w = w.at[r3:r3 + H, 0:2 * CONTROL_SIZE].set(params['w3a'])
    w = w.at[r3 + H:r3 + h2,
             2 * CONTROL_SIZE:2 * CONTROL_SIZE + 1].set(params['w3v'])

    b = jnp.zeros((8, h2), jnp.float32)
    b = b.at[0, 0:H].set(params['b1a'][0])
    b = b.at[0, H:h2].set(params['b1v'][0])
    b = b.at[1, 0:H].set(params['b2a'][0])
    b = b.at[1, H:h2].set(params['b2v'][0])
    b = b.at[2, 0:2 * CONTROL_SIZE].set(params['b3a'][0])
    b = b.at[2, 2 * CONTROL_SIZE].set(params['b3v'][0, 0])
    return {'w': w, 'b': b}


def reference_forward(inputs, params):
    """Pure-JAX reference of the PyTorch forward (non-GRU branch)."""
    a = jnp.tanh(inputs @ params['w1a'] + params['b1a'])
    a = jnp.tanh(a @ params['w2a'] + params['b2a'])
    a = jnp.tanh(a @ params['w3a'] + params['b3a'])
    v = jnp.tanh(inputs @ params['w1v'] + params['b1v'])
    v = jnp.tanh(v @ params['w2v'] + params['b2v'])
    v = v @ params['w3v'] + params['b3v']
    return v, a


if __name__ == "__main__":
    key = jax.random.PRNGKey(0)
    k_in, k_par, k_in2 = jax.random.split(key, 3)

    # --- small config (whole batch in one grid step) ---------------------
    batch = 8
    hidden_size = 32

    inputs = jax.random.normal(k_in, (batch, INPUTS_SIZE), dtype=jnp.float32)
    params = init_params(k_par, hidden_size)
    packed = pack_params(params, hidden_size)

    v, a = policy_forward(inputs, packed)
    jax.block_until_ready((v, a))

    v_ref, a_ref = reference_forward(inputs, params)
    assert v.shape == (batch, 1) and a.shape == (batch, 2 * CONTROL_SIZE)
    assert jnp.allclose(v, v_ref, atol=1e-4, rtol=1e-4)
    assert jnp.allclose(a, a_ref, atol=1e-4, rtol=1e-4)

    # --- larger batch exercising the tiled grid + masked partial block ---
    batch2 = 2500
    inputs2 = jax.random.normal(k_in2, (batch2, INPUTS_SIZE), dtype=jnp.float32)
    v2, a2 = policy_forward(inputs2, packed, block_b=1024)
    jax.block_until_ready((v2, a2))

    v2_ref, a2_ref = reference_forward(inputs2, params)
    assert v2.shape == (batch2, 1) and a2.shape == (batch2, 2 * CONTROL_SIZE)
    assert jnp.allclose(v2, v2_ref, atol=1e-4, rtol=1e-4)
    assert jnp.allclose(a2, a2_ref, atol=1e-4, rtol=1e-4)

    print("KERNEL_OK")
</pallas_src>

<mosaic_0001>
module attributes {stable_mosaic.version = 11 : i64} {
  func.func @_policy_kernel(%arg0: i32, %arg1: memref<8x7xf32, #tpu.memory_space<vmem>>, %arg2: memref<136x64xf32, #tpu.memory_space<vmem>>, %arg3: memref<8x64xf32, #tpu.memory_space<vmem>>, %arg4: memref<8x8xf32, #tpu.memory_space<vmem>>) attributes {dimension_semantics = [#tpu.dimension_semantics<parallel>], iteration_bounds = array<i64: 1>, scalar_prefetch = 0 : i64, scratch_operands = 0 : i64, tpu.core_type = #tpu.core_type<tc>, window_params = [{transform_indices = @transform_0, window_bounds = array<i64: 8, 7>}, {pipeline_mode = #tpu.pipeline_mode<synchronous>, transform_indices = @transform_1, window_bounds = array<i64: 136, 64>}, {pipeline_mode = #tpu.pipeline_mode<synchronous>, transform_indices = @transform_2, window_bounds = array<i64: 8, 64>}, {transform_indices = @transform_3, window_bounds = array<i64: 8, 8>}]} {
    %c0 = arith.constant 0 : index
    %c0_0 = arith.constant 0 : index
    %0 = vector.load %arg1[%c0, %c0_0] : memref<8x7xf32, #tpu.memory_space<vmem>>, vector<8x7xf32>
    %c0_1 = arith.constant 0 : index
    %c0_2 = arith.constant 0 : index
    %1 = vector.load %arg3[%c0_1, %c0_2] : memref<8x64xf32, #tpu.memory_space<vmem>>, vector<8x64xf32>
    %c0_3 = arith.constant 0 : index
    %c0_4 = arith.constant 0 : index
    %2 = vector.load %arg2[%c0_3, %c0_4] : memref<136x64xf32, #tpu.memory_space<vmem>>, vector<7x64xf32>
    %cst = arith.constant dense<0.000000e+00> : vector<8x64xf32>
    %3 = tpu.matmul %0, %2, %cst {dimension_numbers = #tpu.dot_dimension_numbers<[1], [0], [0], [1], [0, 0, 1, 1], [], []>} : vector<8x7xf32>, vector<7x64xf32>, vector<8x64xf32> -> vector<8x64xf32>
    %4 = vector.extract_strided_slice %1 {offsets = [0, 0], sizes = [1, 64], strides = [1, 1]} : vector<8x64xf32> to vector<1x64xf32>
    %5 = vector.broadcast %4 : vector<1x64xf32> to vector<8x64xf32>
    %6 = arith.addf %3, %5 : vector<8x64xf32>
    %7 = math.tanh %6 : vector<8x64xf32>
    %c8 = arith.constant 8 : index
    %c0_5 = arith.constant 0 : index
    %8 = vector.load %arg2[%c8, %c0_5] : memref<136x64xf32, #tpu.memory_space<vmem>>, vector<64x64xf32>
    %cst_6 = arith.constant dense<0.000000e+00> : vector<8x64xf32>
    %9 = tpu.matmul %7, %8, %cst_6 {dimension_numbers = #tpu.dot_dimension_numbers<[1], [0], [0], [1], [0, 0, 1, 1], [], []>} : vector<8x64xf32>, vector<64x64xf32>, vector<8x64xf32> -> vector<8x64xf32>
    %10 = vector.extract_strided_slice %1 {offsets = [1, 0], sizes = [1, 64], strides = [1, 1]} : vector<8x64xf32> to vector<1x64xf32>
    %11 = vector.broadcast %10 : vector<1x64xf32> to vector<8x64xf32>
    %12 = arith.addf %9, %11 : vector<8x64xf32>
    %13 = math.tanh %12 : vector<8x64xf32>
    %c72 = arith.constant 72 : index
    %c0_7 = arith.constant 0 : index
    %14 = vector.load %arg2[%c72, %c0_7] : memref<136x64xf32, #tpu.memory_space<vmem>>, vector<64x64xf32>
    %cst_8 = arith.constant dense<0.000000e+00> : vector<8x64xf32>
    %15 = tpu.matmul %13, %14, %cst_8 {dimension_numbers = #tpu.dot_dimension_numbers<[1], [0], [0], [1], [0, 0, 1, 1], [], []>} : vector<8x64xf32>, vector<64x64xf32>, vector<8x64xf32> -> vector<8x64xf32>
    %16 = vector.extract_strided_slice %1 {offsets = [2, 0], sizes = [1, 64], strides = [1, 1]} : vector<8x64xf32> to vector<1x64xf32>
    %17 = vector.broadcast %16 : vector<1x64xf32> to vector<8x64xf32>
    %18 = arith.addf %15, %17 : vector<8x64xf32>
    %19 = vector.extract_strided_slice %18 {offsets = [0, 0], sizes = [8, 8], strides = [1, 1]} : vector<8x64xf32> to vector<8x8xf32>
    %20 = tpu.iota {dimensions = array<i32: 1>} : vector<8x8xi32>
    %c4_i32 = arith.constant 4 : i32
    %21 = vector.broadcast %c4_i32 : i32 to vector<8x8xi32>
    %22 = arith.cmpi slt, %20, %21 : vector<8x8xi32>
    %23 = math.tanh %19 : vector<8x8xf32>
    %24 = arith.select %22, %23, %19 : vector<8x8xi1>, vector<8x8xf32>
    %25 = tpu.transpose %24, [1, 0] : vector<8x8xf32> -> vector<8x8xf32>
    %c0_9 = arith.constant 0 : index
    %c0_10 = arith.constant 0 : index
    %26 = vector.load %arg4[%c0_9, %c0_10] : memref<8x8xf32, #tpu.memory_space<vmem>>, vector<8x8xf32>
    tpu.vector_store %arg4[%c0_9, %c0_10], %25 {strides = array<i32>} : memref<8x8xf32, #tpu.memory_space<vmem>>, vector<8x8xf32>,
    return
  }
  func.func @transform_0(%arg0: i32) -> (i32, i32) {
    %c0_i32 = arith.constant 0 : i32
    %c0_i32_0 = arith.constant 0 : i32
    return %arg0, %c0_i32 : i32, i32
  }
  func.func @transform_1(%arg0: i32) -> (i32, i32) {
    %c0_i32 = arith.constant 0 : i32
    %c0_i32_0 = arith.constant 0 : i32
    %c0_i32_1 = arith.constant 0 : i32
    return %c0_i32, %c0_i32_0 : i32, i32
  }
  func.func @transform_2(%arg0: i32) -> (i32, i32) {
    %c0_i32 = arith.constant 0 : i32
    %c0_i32_0 = arith.constant 0 : i32
    %c0_i32_1 = arith.constant 0 : i32
    return %c0_i32, %c0_i32_0 : i32, i32
  }
  func.func @transform_3(%arg0: i32) -> (i32, i32) {
    %c0_i32 = arith.constant 0 : i32
    %c0_i32_0 = arith.constant 0 : i32
    return %c0_i32, %arg0 : i32, i32
  }
}

</mosaic_0001>

<bundles_post_ra>
// kernel: tpu_custom_call.1
= control target key start
LH: loop header
LB: loop body
LE: loop exit
PB: predicated region body
PF: predicated region fallthrough
CT: control target
= control target key end

     0   :  { %vm26_vm0 = vcmask 1046528   ;;  %v451_v2 = vmov 0.0   ;;  %vm452_vm1 = vmmov 0   ;;  %vm22_vm2 = vcmask 56320   ;;  %s546_s0 = inlined_call_operand.vmem [shape: f32[8,7], index: 0, kind: input, shape index: {}]   ;;  %s547_s1 = inlined_call_operand.vmem [shape: f32[136,64], index: 1, kind: input, shape index: {}]   ;;  %s548_s2 = inlined_call_operand.vmem [shape: f32[8,64], index: 2, kind: input, shape index: {}]   ;;  %s549_s3 = inlined_call_operand.hbm [shape: f32[8,8], index: 3, kind: output, shape index: {}]  }
   0x1   :  { %v17_v0 = vld [vmem:[%s547_s1] sm:$0x7f]  ;;  %350 = vmatprep.subr.mxu0 %v451_v2  ;;  %352 = vmatprep.mubr.msk.f32.mxu0 %vm452_vm1, %v451_v2  ;;  %v101_v3 = vld [vmem:[%s547_s1 + $0x8] sm:$0xff]  ;;  %v102_v4 = vld [vmem:[%s547_s1 + $0x10] sm:$0xff]  ;;  %v453_v5 = vmov 0.0|0.0  }
   0x2   :  { %v15_v1 = vld [vmem:[%s546_s0] sm:$0xff]  ;;  %351 = vmatpush3.msk.msra.mxu0 %vm26_vm0, %v17_v0  ;;  %393 = vmatprep.subr.bf16.mxu1 %v453_v5  ;;  %v394_v6 = vpack.c.bf16 %v102_v4, %v101_v3 }
   0x3   :  { %8 = vsyncpa [#allocation3], 0  ;;  %353 = vmatmul.mubr.msk.f32.vlgmr.msra.gmra.mrb[0].mxu0 %vm22_vm2, %v15_v1  ;;  %371 = vmatprep.mubr.msk.f32.mxu1 %vm452_vm1, %v451_v2  ;;  %v103_v7 = vld [vmem:[%s547_s1 + $0x18] sm:$0xff]  ;;  %v104_v8 = vld [vmem:[%s547_s1 + $0x20] sm:$0xff]  ;;  %v18_v19 = vlaneseq  ;;  %vm113_vm3 = vcmask 523264   ;;  %vm310_vm5 = vcmask 64512  }
   0x4   :  { %395 = vmatpush3.bf16.msra.mxu1 %v394_v6  ;;  %405 = vmatprep.subr.bf16.mxu0 %v453_v5  ;;  %v397_v9 = vpack.c.bf16 %v104_v8, %v103_v7  ;;  %v105_v10 = vld [vmem:[%s547_s1 + $0x28] sm:$0xff]  ;;  %v106_v11 = vld [vmem:[%s547_s1 + $0x30] sm:$0xff]  ;;  %v107_v13 = vld [vmem:[%s547_s1 + $0x38] sm:$0xff] }
   0x5   :  { %396 = vmatprep.subr.bf16.mxu1 %v453_v5  ;;  %390 = vmatprep.mubr.msk.f32.mxu0 %vm452_vm1, %v451_v2  ;;  %v400_v12 = vpack.c.bf16 %v106_v11, %v105_v10  ;;  %v108_v14 = vld [vmem:[%s547_s1 + $0x40] sm:$0xff]  ;;  %v188_v16 = vld [vmem:[%s547_s1 + $0x48] sm:$0xff]  ;;  %v189_v17 = vld [vmem:[%s547_s1 + $0x50] sm:$0xff]  ;;  %v19_v20 = vshrl.u32 %v18_v19, 7  ;;  %v274_v48 = vand.u32 127, %v18_v19 }
   0x6   :  { %v403_v15 = vpack.c.bf16 %v108_v14, %v107_v13  ;;  %v406_v18 = vpack.c.bf16 %v189_v17, %v188_v16  ;;  %v16_v22 = vld [vmem:[%s548_s2] sm:$0xff]  ;;  %v190_v28 = vld [vmem:[%s547_s1 + $0x58] sm:$0xff]  ;;  %v192_v31 = vld [vmem:[%s547_s1 + $0x68] sm:$0xff] }
   0x7   :  { %v20_v21 = vsub.s32 0, %v19_v20  ;;  %v191_v29 = vld [vmem:[%s547_s1 + $0x60] sm:$0xff]  ;;  %v193_v32 = vld [vmem:[%s547_s1 + $0x70] sm:$0xff]  ;;  %v194_v34 = vld [vmem:[%s547_s1 + $0x78] sm:$0xff]  ;;  %v111_v37 = vsub.s32 1, %v19_v20  ;;  %v198_v43 = vsub.s32 2, %v19_v20 }
   0x8   :  { %398 = vmatpush3.bf16.msra.mxu1 %v397_v9  ;;  %407 = vmatpush3.bf16.msra.mxu0 %v406_v18  ;;  %v409_v30 = vpack.c.bf16 %v191_v29, %v190_v28  ;;  %v412_v33 = vpack.c.bf16 %v193_v32, %v192_v31  ;;  %v195_v35 = vld [vmem:[%s547_s1 + $0x80] sm:$0xff]  ;;  %vm275_vm4 = vcmp.lt.s32.totalorder %v274_v48, 4  ;;  %s454_s1 = smov [#allocation2]  }
   0x9   :  { %399 = vmatprep.subr.bf16.mxu1 %v453_v5  ;;  %408 = vmatprep.subr.bf16.mxu0 %v453_v5  ;;  %v21_v23 = vrot.slane %v16_v22, %v20_v21  ;;  %v415_v36 = vpack.c.bf16 %v195_v35, %v194_v34  ;;  %v112_v38 = vrot.slane %v16_v22, %v111_v37  ;;  %s318_s20 = sshll.u32 %s454_s1, 4  ;;  %s319_s20 = int_to_ptr.vmem [resolvable:$true] %s318_s20 }
   0xa   :  { %v199_v44 = vrot.slane %v16_v22, %v198_v43  ;;  %s427_s21 = scalar_lea.vmem %s319_s20, 128  ;;  %p432_p1 = scmp.lt.s32.totalorder %s319_s20, %s319_s20 }
   0xb   :  { %p428_p0 = scmp.ne.s32.totalorder %s319_s20, %s427_s21  ;;  %p433_p2 = scmp.lt.s32.totalorder %s427_s21, %s427_s21 }
   0xc   :  { %401 = vmatpush3.bf16.msra.mxu1 %v400_v12  ;;  %410 = vmatpush3.bf16.msra.mxu0 %v409_v30 }
   0xd   :  { %402 = vmatprep.subr.bf16.mxu1 %v453_v5  ;;  %411 = vmatprep.subr.bf16.mxu0 %v453_v5  ;;  %p434_p3 = por %p433_p2, %p432_p1 }
   0xf   :  { %p435_p4 = pnand %p434_p3, %p428_p0 }
  0x10   :  { %404 = vmatpush3.bf16.msra.mxu1 %v403_v15  ;;  %413 = vmatpush3.bf16.msra.mxu0 %v412_v33 }
  0x11   :  { %414 = vmatprep.subr.bf16.mxu0 %v453_v5 }
  0x14   :  { %416 = vmatpush3.bf16.msra.mxu0 %v415_v36 }
  0xd6   :  { %v96_v24 = vpop.f32.mrb[0].mxu0 }
  0xd7   :  { %v97_v25 = vadd.f32 %v96_v24, %v21_v23  ;;  %v354_v26 = vpop.f32.mrb[1].mxu0 }
  0xd9   :  { %421 = vtanh.f32 %v97_v25 }
  0xe3   :  { %v422_v27 = vpop.eup %421 }
  0xe4   :  { %372 = vmatmul.mubr.msk.f32.vlgmr.msra.gmra.mrb[0].mxu1 %vm113_vm3, %v422_v27 }
 0x1b7   :  { %v183_v39 = vpop.f32.mrb[0].mxu1 }
 0x1b8   :  { %v184_v40 = vadd.f32 %v183_v39, %v112_v38  ;;  %v373_v41 = vpop.f32.mrb[1].mxu1 }
 0x1ba   :  { %423 = vtanh.f32 %v184_v40 }
 0x1c4   :  { %v424_v42 = vpop.eup %423 }
 0x1c5   :  { %391 = vmatmul.mubr.msk.f32.vlgmr.msra.gmra.mrb[2].mxu0 %vm113_vm3, %v424_v42 }
 0x298   :  { %v269_v45 = vpop.f32.mrb[2].mxu0 }
 0x299   :  { %v270_v46 = vadd.f32 %v269_v45, %v199_v44  ;;  %v392_v47 = vpop.f32.mrb[3].mxu0 }
 0x29b   :  { %425 = vtanh.f32 %v270_v46 }
 0x2a5   :  { %v426_v49 = vpop.eup %425 }
 0x2a6   :  { %v277_v50 = vsel %vm275_vm4, %v426_v49, %v270_v46 }
 0x2a7   :  { %278 = vxpose.xlu0.b32.start.end [1/1] (short) (narrow) %v277_v50, 8 }
 0x327   :  { %v294_v51 = vpop.trf.xlu0 }
 0x328   :  { %311 = vst.msk [vmem:[#allocation2] sm:$0xff] %vm310_vm5, %v294_v51 }
 0x329   :  { %438 = shalt.err (!%p435_p4)
}
 0x32a   :  { %s439_s24 = scalar_lea.hbm %s549_s3, 128 }
 0x32b   :  { %p440_p5 = scmp.ne.s32.totalorder %s549_s3, %s439_s24  ;;  %p443_p6 = scmp.lt.u32.totalorder %s439_s24, %s549_s3 }
 0x32d   :  { %p445_p7 = pnand %p443_p6, %p440_p5 }
 0x32f   :  { %448 = shalt.err (!%p445_p7)
}
 0x330   :  { %321 = dma.vmem_to_hbm [thread:$0]  %s319_s20, 128, %s549_s3, [#allocation3]  }
 0x331   :  { %449 = dma.done.wait [#allocation3], 128  }
 0x332   :  { %450 = vsyncadd [#allocation3], 4294967168 }
 0x333   :  { %325 = vsyncpa [#allocation3], 1 }

</bundles_post_ra>
